<compile_context>
chip_gen: v6e
topology: v6e:2x2x1
jax: 0.10.0
libtpu: 0.0.40
codegen_flags: <defaults>
</compile_context>

<pallas_src>
import functools

import jax
import jax.numpy as jnp
from jax.experimental import pallas as pl
from jax.experimental.pallas import tpu as pltpu


def _assemble_kernel(emb_ref, ctx_ref, out_ref, *, n_ctx):
    # emb_ref: (B, L, D)   ctx_ref: (B, n_ctx, D)   out_ref: (B, L, D)
    # 1) one aligned full-block store of the contiguous embedding block
    out_ref[...] = emb_ref[...]
    # 2) single overwrite of the learnable-context rows (the only masked store)
    out_ref[:, 1:1 + n_ctx, :] = ctx_ref[...]


def _pick_block_rows(n, seq, n_ctx, d, itemsize, *,
                     target_rows=24, vmem_budget_bytes=28 * (1 << 20)):
    """Choose rows-per-block: as large as possible (fewer grid steps, fewer
    DMAs) subject to (a) double-buffered in+out+ctx staying under a VMEM
    budget that is safe on v5e/v6e (128 MiB) AND v7x (64 MiB per TC), and
    (b) at least 2 grid steps when n > 1 so the pipeline and v7x's second
    TensorCore have work."""
    # bytes per prompt row per pipeline stage: emb block + out block + ctx block,
    # times 2 for double buffering.
    per_row = (2 * seq + n_ctx) * d * itemsize * 2
    b = max(1, min(target_rows, vmem_budget_bytes // per_row))
    if n > 1:
        b = min(b, pl.cdiv(n, 2))   # guarantee >= 2 grid steps
    return int(max(1, min(b, n)))


def assemble_prompts(embedding, ctx):
    """Pallas equivalent of
    torch.cat([embedding[:, :1], ctx, embedding[:, 1+n_ctx:]], dim=1)."""
    n, seq, d = embedding.shape
    nc, n_ctx, dc = ctx.shape
    assert nc == n and dc == d
    # NOTE: suf_len == 0 (1 + n_ctx == seq) is still correct here; __init__
    # requires suf_len > 0 only to mirror the original module's structure.
    assert 1 + n_ctx <= seq
    assert ctx.dtype == embedding.dtype, "ctx / embedding dtype mismatch"

    itemsize = jnp.dtype(embedding.dtype).itemsize
    b = _pick_block_rows(n, seq, n_ctx, d, itemsize)
    grid = (pl.cdiv(n, b),)   # Pallas masks the ragged last block

    # Double-buffered working set; raise the scoped-VMEM limit so v5e's 16 MiB
    # default doesn't reject larger blocks.  Cap at 48 MiB (safe on v7x's
    # 64 MiB-per-TC physical VMEM).
    working_set = 2 * (b * seq * d + b * seq * d + b * n_ctx * d) * itemsize
    vmem_limit = int(min(48 << 20, max(32 << 20, working_set + (4 << 20))))

    bytes_accessed = (n * seq * d + n * n_ctx * d + n * seq * d) * itemsize

    kernel = functools.partial(_assemble_kernel, n_ctx=n_ctx)

    return pl.pallas_call(
        kernel,
        out_shape=jax.ShapeDtypeStruct((n, seq, d), embedding.dtype),
        grid=grid,
        in_specs=[
            # last two block dims equal full array dims -> (8,128) rule satisfied
            pl.BlockSpec((b, seq, d), lambda i: (i, 0, 0)),
            pl.BlockSpec((b, n_ctx, d), lambda i: (i, 0, 0)),
        ],
        out_specs=pl.BlockSpec((b, seq, d), lambda i: (i, 0, 0)),
        compiler_params=pltpu.CompilerParams(
            dimension_semantics=("parallel",),
            vmem_limit_bytes=vmem_limit),
        cost_estimate=pl.CostEstimate(
            flops=0, transcendentals=0, bytes_accessed=bytes_accessed),
    )(embedding, ctx)


class PromptLearnerPallas:
    """JAX/Pallas re-implementation of PromptLearner (forward pass only).

    Parameters are initialized deterministically in-script:
      * ctx / ct_class   ~ Normal(0, 0.02)  (matches nn.init.normal_(std=0.02))
      * token embeddings ~ Normal(0, 1)     (stand-in for the frozen CLIP
                                             token_embedding lookup; buffers)
    """

    def __init__(self, key, *, n_cls_task, n_cls_class, n_ctx, ctx_dim, seq_len,
                 dtype=jnp.float32):
        k1, k2, k3, k4 = jax.random.split(key, 4)
        suf_len = seq_len - 1 - n_ctx
        assert suf_len > 0

        # learnable contexts
        self.ctx = (0.02 * jax.random.normal(
            k1, (n_cls_task, n_ctx, ctx_dim))).astype(dtype)
        self.ct_class = (0.02 * jax.random.normal(
            k2, (n_cls_class, n_ctx, ctx_dim))).astype(dtype)

        # frozen token-embedding buffers (synthetic stand-in for CLIP embeddings)
        # TODO(synk): real CLIP tokenization + token_embedding lookup has no Pallas
        #             equivalent here; buffers are synthesized deterministically.
        self.embedding = jax.random.normal(
            k3, (n_cls_task, seq_len, ctx_dim)).astype(dtype)
        self.embedding_class = jax.random.normal(
            k4, (n_cls_class, seq_len, ctx_dim)).astype(dtype)

        # buffers kept for API parity / reference checking (not used by the kernel)
        self.token_prefix = self.embedding[:, :1, :]
        self.token_suffix = self.embedding[:, 1 + n_ctx:, :]
        self.token_prefix_class = self.embedding_class[:, :1, :]
        self.token_suffix_class = self.embedding_class[:, 1 + n_ctx:, :]

        self.n_ctx = n_ctx
        self.class_token_position = "end"

    def forward(self):
        if self.class_token_position != "end":
            raise ValueError
        prompts_task = assemble_prompts(self.embedding, self.ctx)
        prompts_class = assemble_prompts(self.embedding_class, self.ct_class)
        return prompts_class, prompts_task


if __name__ == "__main__":
    # Small shapes consistent with the module's structure
    # (original: n_cls_task=10, n_cls_class=100, n_ctx=10, ctx_dim=768, seq_len=77)
    n_cls_task, n_cls_class = 2, 4
    n_ctx, ctx_dim, seq_len = 4, 32, 16

    key = jax.random.PRNGKey(0)
    learner = PromptLearnerPallas(
        key,
        n_cls_task=n_cls_task,
        n_cls_class=n_cls_class,
        n_ctx=n_ctx,
        ctx_dim=ctx_dim,
        seq_len=seq_len,
    )

    prompts_class, prompts_task = learner.forward()
    prompts_class = jax.block_until_ready(prompts_class)
    prompts_task = jax.block_until_ready(prompts_task)

    # Reference check against plain-JAX concatenation (same semantics as torch.cat dim=1)
    ref_task = jnp.concatenate(
        [learner.token_prefix, learner.ctx, learner.token_suffix], axis=1)
    ref_class = jnp.concatenate(
        [learner.token_prefix_class, learner.ct_class, learner.token_suffix_class],
        axis=1)

    assert prompts_task.shape == (n_cls_task, seq_len, ctx_dim)
    assert prompts_class.shape == (n_cls_class, seq_len, ctx_dim)
    assert jnp.allclose(prompts_task, ref_task)
    assert jnp.allclose(prompts_class, ref_class)

    print("KERNEL_OK")
</pallas_src>

<mosaic_0001>
module attributes {stable_mosaic.version = 11 : i64} {
  func.func @_assemble_kernel(%arg0: i32, %arg1: memref<1x16x32xf32, #tpu.memory_space<vmem>>, %arg2: memref<1x4x32xf32, #tpu.memory_space<vmem>>, %arg3: memref<1x16x32xf32, #tpu.memory_space<vmem>>) attributes {dimension_semantics = [#tpu.dimension_semantics<parallel>], iteration_bounds = array<i64: 2>, scalar_prefetch = 0 : i64, scratch_operands = 0 : i64, tpu.core_type = #tpu.core_type<tc>, window_params = [{transform_indices = @transform_0, window_bounds = array<i64: 1, 16, 32>}, {transform_indices = @transform_1, window_bounds = array<i64: 1, 4, 32>}, {transform_indices = @transform_2, window_bounds = array<i64: 1, 16, 32>}]} {
    %c0 = arith.constant 0 : index
    %c0_0 = arith.constant 0 : index
    %c0_1 = arith.constant 0 : index
    %0 = vector.load %arg1[%c0, %c0_0, %c0_1] : memref<1x16x32xf32, #tpu.memory_space<vmem>>, vector<1x16x32xf32>
    %c0_2 = arith.constant 0 : index
    %c0_3 = arith.constant 0 : index
    %c0_4 = arith.constant 0 : index
    %1 = vector.load %arg3[%c0_2, %c0_3, %c0_4] : memref<1x16x32xf32, #tpu.memory_space<vmem>>, vector<1x16x32xf32>
    tpu.vector_store %arg3[%c0_2, %c0_3, %c0_4], %0 {strides = array<i32>} : memref<1x16x32xf32, #tpu.memory_space<vmem>>, vector<1x16x32xf32>,
    %c0_5 = arith.constant 0 : index
    %c0_6 = arith.constant 0 : index
    %c0_7 = arith.constant 0 : index
    %2 = vector.load %arg2[%c0_5, %c0_6, %c0_7] : memref<1x4x32xf32, #tpu.memory_space<vmem>>, vector<1x4x32xf32>
    %c0_8 = arith.constant 0 : index
    %c1 = arith.constant 1 : index
    %c0_9 = arith.constant 0 : index
    %3 = vector.load %arg3[%c0_8, %c1, %c0_9] : memref<1x16x32xf32, #tpu.memory_space<vmem>>, vector<1x4x32xf32>
    tpu.vector_store %arg3[%c0_8, %c1, %c0_9], %2 {strides = array<i32>} : memref<1x16x32xf32, #tpu.memory_space<vmem>>, vector<1x4x32xf32>,
    return
  }
  func.func @transform_0(%arg0: i32) -> (i32, i32, i32) {
    %c0_i32 = arith.constant 0 : i32
    %c0_i32_0 = arith.constant 0 : i32
    %c0_i32_1 = arith.constant 0 : i32
    return %arg0, %c0_i32, %c0_i32_0 : i32, i32, i32
  }
  func.func @transform_1(%arg0: i32) -> (i32, i32, i32) {
    %c0_i32 = arith.constant 0 : i32
    %c0_i32_0 = arith.constant 0 : i32
    %c0_i32_1 = arith.constant 0 : i32
    return %arg0, %c0_i32, %c0_i32_0 : i32, i32, i32
  }
  func.func @transform_2(%arg0: i32) -> (i32, i32, i32) {
    %c0_i32 = arith.constant 0 : i32
    %c0_i32_0 = arith.constant 0 : i32
    %c0_i32_1 = arith.constant 0 : i32
    return %arg0, %c0_i32, %c0_i32_0 : i32, i32, i32
  }
}

</mosaic_0001>

<bundles_post_ra>
// kernel: tpu_custom_call.1
= control target key start
LH: loop header
LB: loop body
LE: loop exit
PB: predicated region body
PF: predicated region fallthrough
CT: control target
= control target key end

     0   :  { %7 = vsyncpa [#allocation3], 0  ;;  %s734_s0 = inlined_call_operand.hbm [shape: f32[2,16,32], index: 0, kind: input, shape index: {}]   ;;  %s735_s1 = inlined_call_operand.hbm [shape: f32[2,4,32], index: 1, kind: input, shape index: {}]   ;;  %s736_s2 = inlined_call_operand.hbm [shape: f32[2,16,32], index: 2, kind: output, shape index: {}]  }
   0x1   :  { %9 = vsyncpa [#allocation3 + $0x1], 0 }
   0x2   :  { %10 = vsyncpa [#allocation6], 0 }
   0x3   :  { %12 = vsyncpa [#allocation6 + $0x1], 0 }
   0x4   :  { %13 = vsyncpa [#allocation4], 0 }
   0x5   :  { %15 = vsyncpa [#allocation4 + $0x1], 0  ;;  %s539_s9 = smov 0   ;;  %s541_s10 = smov 0  }
   0x6   :  { %s543_s11 = smov 0   ;;  %s545_s12 = smov 0  }
   0x7 LB: > { %s560_s13 = sadd.s32 4294967295, %s515_s12   ;;  %s317_s14 = sadd.s32 4294967294, %s515_s12   ;;  %s515_s12 = sphi %s545_s12, %s753_s12   ;;  %s511_s11 = sphi %s543_s11, %s752_s11   ;;  %s507_s10 = sphi %s541_s10, %s751_s10   ;;  %s503_s9 = sphi %s539_s9, %s750_s9  }
   0x8   : > { %s564_s15 = sadd.s32 1, %s515_s12   ;;  %s28_s16 = sadd.s32 1, %s511_s11 }
   0x9   : > { %s25_s17 = ssub.s32 %s515_s12, %s564_s15  ;;  %p35_p0 = scmp.ne.s32.totalorder %s511_s11, %s507_s10 }
   0xa   : > { %p26_p1 = scmp.eq.s32.totalorder %s25_s17, 0  ;;  %p36_p2 = scmp.eq.s32.totalorder %s515_s12, 0 }
   0xb   : > { %p41_p3 = scmp.ne.s32.totalorder %s507_s10, %s503_s9  ;;  %p42_p4 = scmp.eq.s32.totalorder %s560_s13, 0 }
   0xc   : > { %s576_s18 = scalar_select %p26_p1, %s511_s11, %s28_s16  }
   0xd   : > { %p578_p5 = por %p36_p2, %p35_p0  ;;  %p582_p6 = por %p42_p4, %p41_p3 }
   0xe   : > { %p91_p7 = scmp.eq.s32.totalorder %s560_s13, 1  ;;  %p97_p8 = scmp.eq.s32.totalorder %s317_s14, 1 }
   0xf   : > { %s740_s20 = scalar_select %p582_p6, 1, 0 }
  0x10   : > { %p353_p10 = scmp.lt.s32.totalorder %s515_s12, 2  ;;  %p589_p11 = por %p91_p7, %p35_p0 }
  0x11   : > { %p593_p12 = por %p97_p8, %p41_p3  ;;  %s598_s23 = sand.u32 1, %s511_s11  }
  0x12   : > { %s741_s21 = scalar_select %p589_p11, 1, 0 }
  0x13   : > { %s742_s22 = scalar_select %p593_p12, 1, 0 }
  0x14   : > { %s334_s24 = sshll.u32 %s515_s12, 8  ;;  %s320_s25 = sshll.u32 %s598_s23, 4 }
  0x15   : > { %s605_s28 = scalar_lea.hbm %s734_s0, %s334_s24  ;;  %s121_s29 = scalar_lea.vmem [#allocation2], %s320_s25 }
  0x16   : > { %s128_s30 = sshll.u32 %s121_s29, 4  ;;  %p609_p13 = pnand %p353_p10, %p578_p5  ;;  %s613_s30 = int_to_ptr.vmem [resolvable:$true] %s128_s30 }
  0x17   : > { %s118_s4 = scalar_lea.sflag [#allocation3], %s598_s23  ;;  %s391_s5 = scalar_lea.hbm %s605_s28, 256 }
  0x18   : > { %p392_p0 = scmp.ne.s32.totalorder %s605_s28, %s391_s5  ;;  %p393_p1 = pneg %p609_p13 }
  0x19   : > { %s396_s8 = scalar_lea.hbm %s734_s0, 512  ;;  %p397_p4 = scmp.lt.s32.totalorder %s605_s28, %s734_s0 }
  0x1a   : > { %p394_p2 = pnand %p393_p1, %p392_p0  ;;  %p398_p5 = scmp.lt.s32.totalorder %s396_s8, %s391_s5 }
  0x1c   : > { %p395_p3 = pneg %p394_p2  ;;  %p399_p7 = por %p398_p5, %p397_p4 }
  0x1e   : > { %p400_p8 = pnand %p399_p7, %p395_p3 }
  0x20   : > { %403 = shalt.err (!%p400_p8)
}
  0x21   : > { %s404_s17 = scalar_lea.vmem %s613_s30, 256  ;;  %s517_s19 = smov [#allocation2]  }
  0x22   : > { %p405_p10 = scmp.ne.s32.totalorder %s613_s30, %s404_s17  ;;  %s409_s24 = sshll.u32 %s517_s19, 4  ;;  %s410_s24 = int_to_ptr.vmem [resolvable:$false] %s409_s24 }
  0x23   : > { %s411_s25 = scalar_lea.vmem %s410_s24, 512  ;;  %p412_p9 = scmp.lt.s32.totalorder %s613_s30, %s410_s24 }
  0x24   : > { %p407_p0 = pnand %p405_p10, %p393_p1  ;;  %p413_p12 = scmp.lt.s32.totalorder %s411_s25, %s404_s17 }
  0x26   : > { %p408_p2 = pneg %p407_p0  ;;  %p414_p11 = por %p413_p12, %p412_p9 }
  0x28   : > { %p415_p4 = pnand %p414_p11, %p408_p2 }
  0x2a   : > { %418 = shalt.err (!%p415_p4)
}
  0x2b   : > { %s518_s26 = smov 128   ;;  %s519_s27 = smov 8  }
  0x2c   : > { %345 = dma.hbm_to_vmem [thread:$0]  (!%p609_p13), %s605_s28, 256, %s613_s30, %s118_s4, %s518_s26, %s518_s26, %s519_s27  }
  0x2d   : > { %p325_p3 = scmp.ge.s32.totalorder %s515_s12, 1  ;;  %p154_p5 = scmp.lt.s32.totalorder %s515_s12, 3 }
  0x2e   : > { %s323_s29 = sshll.u32 %s598_s23, 2  ;;  %s324_s6 = sshll.u32 %s515_s12, 6 }
  0x2f   : > { %p645_p9 = pnand %p325_p3, %p154_p5  ;;  %s142_s7 = scalar_lea.vmem [#allocation5], %s323_s29 }
  0x30   : > { %s149_s8 = sshll.u32 %s142_s7, 4  ;;  %s147_s17 = scalar_lea.hbm %s735_s1, %s324_s6  ;;  %s150_s8 = int_to_ptr.vmem [resolvable:$true] %s149_s8 }
  0x31   : > { %s744_s5 = scalar_select %p645_p9, 1, 0 }
  0x32   : > { %s139_s19 = scalar_lea.sflag [#allocation6], %s598_s23  ;;  %s419_s24 = scalar_lea.hbm %s147_s17, 64 }
  0x33   : > { %p420_p11 = scmp.ne.s32.totalorder %s147_s17, %s419_s24  ;;  %s424_s4 = scalar_lea.hbm %s735_s1, 128 }
  0x34   : > { %p425_p8 = scmp.lt.s32.totalorder %s147_s17, %s735_s1  ;;  %p426_p10 = scmp.lt.s32.totalorder %s424_s4, %s419_s24 }
  0x35   : > { %p422_p12 = pnand %p420_p11, %p393_p1 }
  0x36   : > { %p427_p0 = por %p426_p10, %p425_p8 }
  0x37   : > { %p423_p7 = pneg %p422_p12 }
  0x39   : > { %p428_p2 = pnand %p427_p0, %p423_p7 }
  0x3b   : > { %431 = shalt.err (!%p428_p2)
}
  0x3c   : > { %s432_s27 = scalar_lea.vmem %s150_s8, 64  ;;  %s520_s23 = smov [#allocation5]  }
  0x3d   : > { %p433_p4 = scmp.ne.s32.totalorder %s150_s8, %s432_s27  ;;  %s437_s29 = sshll.u32 %s520_s23, 4  ;;  %s438_s29 = int_to_ptr.vmem [resolvable:$false] %s437_s29 }
  0x3e   : > { %s439_s6 = scalar_lea.vmem %s438_s29, 128  ;;  %p440_p11 = scmp.lt.s32.totalorder %s150_s8, %s438_s29 }
  0x3f   : > { %p435_p3 = pnand %p433_p4, %p393_p1  ;;  %p441_p12 = scmp.lt.s32.totalorder %s439_s6, %s432_s27 }
  0x41   : > { %p436_p5 = pneg %p435_p3  ;;  %p442_p6 = por %p441_p12, %p440_p11 }
  0x43   : > { %p443_p9 = pnand %p442_p6, %p436_p5 }
  0x45   : > { %446 = shalt.err (!%p443_p9)
}
  0x46   : > { %348 = dma.hbm_to_vmem [thread:$0]  (!%p609_p13), %s147_s17, 64, %s150_s8, %s139_s19  }
  0x47   : > { %p745_p7 = scmp.ne.s32.totalorder %s744_s5, 0 }
  0x48   : > { %s671_s7 = sand.u32 (!%p745_p7), 1, %s507_s10   ;;  %p746_p1 = scmp.ne.s32.totalorder (!%p745_p7), %s740_s20, 0 }
  0x49   : > { %158 = sbr.rel (%p745_p7) target bundleno = 108 (0x6c), region = 28  ;;  %s326_s14 = sshll.u32 (!%p745_p7), %s671_s7, 4 }
  0x4a   : > { %s161_s16 = scalar_lea.sflag (!%p745_p7), [#allocation3], %s671_s7  ;;  %s164_s24 = scalar_lea.vmem (!%p745_p7), [#allocation2], %s326_s14 }
  0x4e   : > { %490 = dma.done.wait (%p746_p1), %s161_s16, 256  }
  0x4f   : > { %492 = vsyncadd (%p746_p1), %s161_s16, 4294967040  ;;  %s327_s3 = sshll.u32 %s671_s7, 2  ;;  %s170_s5 = scalar_lea.sflag [#allocation6], %s671_s7 }
  0x50   : > { %s173_s8 = scalar_lea.vmem [#allocation5], %s327_s3 }
  0x51   : > { %494 = dma.done.wait (%p746_p1), %s170_s5, 64  }
  0x52   : > { %496 = vsyncadd (%p746_p1), %s170_s5, 4294967232  ;;  %s198_s17 = scalar_lea.vmem [#allocation7], %s326_s14  ;;  %s335_s28 = sshll.u32 %s560_s13, 8  ;;  %vm201_vm0 = vcmask 261120   ;;  %vm205_vm1 = vcmask 257024   ;;  %v199_v0 = vld [vmem:[%s164_s24] sm:$0xff] }
  0x53   : > { %s221_s19 = sshll.u32 %s198_s17, 4  ;;  %s691_s25 = scalar_lea.hbm %s736_s2, %s335_s28  ;;  %v200_v1 = vld [vmem:[%s164_s24 + $0x8] sm:$0xff]  ;;  %v204_v2 = vld [vmem:[%s173_s8] sm:$0xf]  ;;  %202 = vst.msk [vmem:[%s198_s17] sm:$0xff] %vm201_vm0, %v199_v0  ;;  %s686_s19 = int_to_ptr.vmem [resolvable:$true] %s221_s19 }
  0x54   : > { %203 = vst.msk [vmem:[%s198_s17 + $0x8] sm:$0xff] %vm201_vm0, %v200_v1  ;;  %s208_s20 = scalar_lea.sflag [#allocation4], %s671_s7  ;;  %s447_s13 = scalar_lea.vmem %s686_s19, 256 }
  0x55   : > { %206 = vst.msk [vmem:[%s198_s17 + $0x1] sm:$0xf] %vm205_vm1, %v204_v2  ;;  %p448_p6 = scmp.ne.s32.totalorder %s686_s19, %s447_s13  ;;  %p747_p13 = scmp.ne.s32.totalorder %s741_s21, 0 }
  0x56   : > { %s521_s26 = smov [#allocation7]  }
  0x57   : > { %p449_p9 = pnand %p448_p6, %p747_p13  ;;  %s451_s27 = sshll.u32 %s521_s26, 4  ;;  %s452_s27 = int_to_ptr.vmem [resolvable:$false] %s451_s27 }
  0x58   : > { %s453_s23 = scalar_lea.vmem %s452_s27, 512  ;;  %p454_p10 = scmp.lt.s32.totalorder %s686_s19, %s452_s27 }
  0x59   : > { %p450_p8 = pneg %p449_p9  ;;  %p455_p0 = scmp.lt.s32.totalorder %s453_s23, %s447_s13 }
  0x5b   : > { %p456_p2 = por %p455_p0, %p454_p10 }
  0x5d   : > { %p457_p4 = pnand %p456_p2, %p450_p8 }
  0x5f   : > { %460 = shalt.err (!%p457_p4)
}
  0x60   : > { %s461_s29 = scalar_lea.hbm %s691_s25, 256  ;;  %s465_s16 = scalar_lea.hbm %s736_s2, 512 }
  0x61   : > { %p462_p3 = scmp.ne.s32.totalorder %s691_s25, %s461_s29  ;;  %p466_p12 = scmp.lt.s32.totalorder %s691_s25, %s736_s2 }
  0x62   : > { %p467_p7 = scmp.lt.s32.totalorder %s465_s16, %s461_s29 }
  0x63   : > { %p463_p5 = pnand %p462_p3, %p747_p13 }
  0x64   : > { %p468_p1 = por %p467_p7, %p466_p12 }
  0x65   : > { %p464_p11 = pneg %p463_p5 }
  0x67   : > { %p469_p6 = pnand %p468_p1, %p464_p11 }
  0x69   : > { %472 = shalt.err (!%p469_p6)
}
  0x6a   : > { %s522_s5 = smov 128   ;;  %s523_s8 = smov 8  }
  0x6b   : > { %340 = dma.vmem_to_hbm [thread:$0]  (%p747_p13), %s686_s19, 256, %s691_s25, %s208_s20, %s522_s5, %s522_s5, %s523_s8  }
  0x6c PF: > { %s236_s17 = sand.u32 1, %s503_s9   ;;  %p748_p9 = scmp.ne.s32.totalorder %s742_s22, 0 }
  0x6d   : > { %p749_p8 = scmp.ge.s32.totalorder %s515_s12, 2  ;;  %s237_s28 = scalar_lea.sflag [#allocation4], %s236_s17 }
  0x6f   : > { %p350_p10 = pnand %p749_p8, %p748_p9 }
  0x71   : > { %p351_p0 = pneg %p350_p10 }
  0x73   : > { %498 = dma.done.wait (%p351_p0), %s237_s28, 256  }
  0x74   : > { %500 = vsyncadd (%p351_p0), %s237_s28, 4294967040  ;;  %p18_p2 = scmp.ge.s32.totalorder %s564_s15, 4   ;;  %s750_s9 = smov %s507_s10 }
  0x75   : > { %s751_s10 = smov %s511_s11  ;;  %s752_s11 = smov %s576_s18 }
  0x76   : > { %s753_s12 = smov %s564_s15  ;;  %20 = sbr.rel (!%p18_p2) target bundleno = 7 (0x7), region = 86 }
  0x7b   :  { %242 = vsyncpa [#allocation3], 1 }
  0x7c   :  { %244 = vsyncpa [#allocation3 + $0x1], 1 }
  0x7d   :  { %245 = vsyncpa [#allocation6], 1 }
  0x7e   :  { %247 = vsyncpa [#allocation6 + $0x1], 1 }
  0x7f   :  { %248 = vsyncpa [#allocation4], 1 }
  0x80   :  { %250 = vsyncpa [#allocation4 + $0x1], 1 }

</bundles_post_ra>
